<compile_context>
chip_gen: v5e
topology: v5e:2x2
jax: 0.10.0
libtpu: 0.0.40
codegen_flags: <defaults>
</compile_context>

<pallas_src>
import functools

import jax
import jax.numpy as jnp
import numpy as np
from jax.experimental import pallas as pl
from jax.experimental.pallas import tpu as pltpu


def _fold_rows(x, tps):
    """(tps, 128) -> (8, 128) by summing groups of 8 sublane rows (pure VALU)."""
    if tps == 8:
        return x
    return jnp.sum(x.reshape(tps // 8, 8, 128), axis=0)


def _dice_kernel(logits_ref, labels_ref, out_ref, acc_ref, *, from_logits,
                 mask_value):
    C, tps, _ = logits_ref.shape
    t = pl.program_id(2)

    @pl.when(t == 0)
    def _():
        acc_ref[...] = jnp.zeros_like(acc_ref)

    # One widening per tile (robust mask layout); every class compare below is
    # against a scalar id — no iota plane, nothing regenerated per tile.
    labels = labels_ref[...].astype(jnp.int32)                # (tps, 128)
    if mask_value is not None:
        valid = labels != mask_value                           # padded / ignored

    f32 = jnp.float32
    if from_logits:
        # Per-pixel softmax over classes, unrolled across the C pixel slabs.
        xs = [logits_ref[c].astype(f32) for c in range(C)]     # (tps, 128) each
        m = xs[0]
        for c in range(1, C):
            m = jnp.maximum(m, xs[c])
        es = [jnp.exp(x - m) for x in xs]                      # EUP
        denom = es[0]
        for c in range(1, C):
            denom = denom + es[c]
        inv = pl.reciprocal(denom, approx=True)                # EUP vrcp
        probs = [e * inv for e in es]
    else:
        probs = [logits_ref[c].astype(f32) for c in range(C)]

    for c in range(C):
        p_c = probs[c]
        eq = labels == c                                       # scalar class id
        if mask_value is not None:
            eq = jnp.logical_and(eq, valid)
            p_m = jnp.where(valid, p_c, 0.0)
        else:
            p_m = p_c
        onehot = eq.astype(f32)
        inter_part = jnp.where(eq, p_c, 0.0)
        union_part = p_m + onehot                              # fused union stream
        acc_ref[pl.ds(c * 8, 8), :] += _fold_rows(inter_part, tps)
        acc_ref[pl.ds((C + c) * 8, 8), :] += _fold_rows(union_part, tps)

    @pl.when(t == pl.num_programs(2) - 1)
    def _():
        out_ref[...] = acc_ref[...]


def _plan_tiling(rows, C, logits_itemsize, labels_fit_int8, target_bytes):
    """Pick the pixel-row tile (TPS) and label dtype.

    Alignment follows dtype packing of the *blocked* arrays: int8 labels need
    32-row tiles, bf16 logits 16, f32 8.  The TPS target is sized at 4 bytes /
    element (the kernel upcasts each slab to f32).
    """
    use_int8 = labels_fit_int8 and C <= 256
    align = 32 if use_int8 else (16 if logits_itemsize == 2 else 8)
    per_row_f32 = C * 128 * 4
    tps = max(align, (target_bytes // per_row_f32) // align * align)
    rows_aligned = -(-rows // align) * align
    tps = min(tps, rows_aligned)
    return tps, (jnp.int8 if use_int8 else jnp.int32)


def dice_loss(inputs, targets, *, smooth=1e-5, from_logits=True,
              ignore_index=None, block_bytes=4 * 1024 * 1024):
    """Pallas TPU DiceLoss forward.

    inputs:  (B, C, H, W) logits (or probabilities if from_logits=False)
    targets: (B, H, W) integer class labels
    returns: scalar float32 loss
    """
    if smooth < 0:
        raise ValueError(f"smooth must be non-negative, got {smooth}")
    if ignore_index is not None and not isinstance(ignore_index, int):
        raise ValueError(f"ignore_index must be an integer or None, got {ignore_index}")
    if inputs.ndim != 4 or targets.ndim != 3:
        raise ValueError(f"bad ranks: {inputs.shape} / {targets.shape}")
    B, C, H, W = inputs.shape
    if targets.shape != (B, H, W):
        raise ValueError(f"shape mismatch: {inputs.shape} vs {targets.shape}")

    P = H * W
    rows = -(-P // 128)

    # Label value range (include the -1 padding sentinel) -> label dtype.
    lo, hi = -1, C - 1
    if ignore_index is not None:
        lo, hi = min(lo, ignore_index), max(hi, ignore_index)
    labels_fit_int8 = (lo >= -128 and hi <= 127)
    tps, label_dtype = _plan_tiling(rows, C, inputs.dtype.itemsize,
                                    labels_fit_int8, block_bytes)

    tiles0 = -(-rows // tps)
    n_split = 2 if tiles0 >= 2 else 1            # v7x megacore pixel split
    tiles = -(-tiles0 // n_split) * n_split
    tiles_per_split = tiles // n_split
    rows_pad = tiles * tps
    P_pad = rows_pad * 128
    pad = P_pad - P

    if ignore_index is not None:
        mask_value = int(ignore_index)
    elif pad > 0:
        mask_value = -1                           # sentinel for padded pixels
    else:
        mask_value = None                         # no masking ops at all

    logits = inputs.reshape(B, C, P)
    labels = targets.reshape(B, P)
    if pad > 0:
        logits = jnp.pad(logits, ((0, 0), (0, 0), (0, pad)))
        labels = jnp.pad(labels, ((0, 0), (0, pad)), constant_values=mask_value)
    logits = logits.reshape(B, C, rows_pad, 128)
    labels = labels.reshape(B, rows_pad, 128).astype(label_dtype)

    kernel = functools.partial(_dice_kernel, from_logits=bool(from_logits),
                               mask_value=mask_value)

    acc_rows = 2 * C * 8
    block_logits = C * tps * 128 * logits.dtype.itemsize
    block_labels = tps * 128 * labels.dtype.itemsize
    temps = (2 * C + 6) * tps * 128 * 4           # in-kernel f32 slab liveness
    vmem_limit = int(min(2 * (block_logits + block_labels) + temps + (8 << 20),
                         32 << 20))

    out = pl.pallas_call(
        kernel,
        out_shape=jax.ShapeDtypeStruct((B, n_split, acc_rows, 128), jnp.float32),
        grid_spec=pltpu.PrefetchScalarGridSpec(
            num_scalar_prefetch=0,
            grid=(B, n_split, tiles_per_split),
            in_specs=[
                pl.BlockSpec((None, C, tps, 128),
                             lambda b, s, t: (b, 0, s * tiles_per_split + t, 0)),
                pl.BlockSpec((None, tps, 128),
                             lambda b, s, t: (b, s * tiles_per_split + t, 0)),
            ],
            out_specs=pl.BlockSpec((None, None, acc_rows, 128),
                                   lambda b, s, t: (b, s, 0, 0)),
            scratch_shapes=[pltpu.VMEM((acc_rows, 128), jnp.float32)],
        ),
        compiler_params=pltpu.CompilerParams(
            dimension_semantics=("parallel", "parallel", "arbitrary"),
            vmem_limit_bytes=vmem_limit,
        ),
    )(logits, labels)

    # Combine per-split, per-lane partial sums; do dice + mean in the wrapper.
    sums = out.reshape(B, n_split, 2, C, 8 * 128).sum(axis=(1, 4))   # (B, 2, C)
    inter = sums[:, 0, :]
    union = sums[:, 1, :]
    sm = jnp.float32(smooth)
    dice = (2.0 * inter + sm) / (union + sm)
    # TODO(synk): the PyTorch module raises RuntimeError when union <= smooth;
    # data-dependent exceptions have no in-kernel equivalent.
    return (jnp.float32(1.0) - jnp.mean(dice)).astype(jnp.float32)


def _dice_loss_ref(inputs, targets, *, smooth=1e-5, from_logits=True,
                   ignore_index=None):
    """Pure-JAX reference mirroring the PyTorch module."""
    B, C, H, W = inputs.shape
    x = inputs.astype(jnp.float32)
    probs = jax.nn.softmax(x, axis=1) if from_logits else x
    onehot = jax.nn.one_hot(targets, C, axis=1, dtype=jnp.float32)
    if ignore_index is not None:
        mask = (targets != ignore_index).astype(jnp.float32)[:, None]
        probs = probs * mask
        onehot = onehot * mask
    pf = probs.reshape(B, C, -1)
    tf = onehot.reshape(B, C, -1)
    inter = jnp.sum(pf * tf, axis=-1)
    union = jnp.sum(pf, axis=-1) + jnp.sum(tf, axis=-1) + smooth
    dice = (2.0 * inter + smooth) / union
    return 1.0 - jnp.mean(dice)


if __name__ == "__main__":
    key = jax.random.PRNGKey(0)
    k1, k2, k3, k4 = jax.random.split(key, 4)

    # Tolerance slightly looser than exact because the in-kernel softmax
    # denominator uses the EUP approximate reciprocal.
    tol = dict(rtol=1e-3, atol=1e-3)

    B, C, H, W = 2, 4, 16, 16
    x = jax.random.normal(k1, (B, C, H, W), dtype=jnp.float32)
    y = jax.random.randint(k2, (B, H, W), 0, C, dtype=jnp.int32)

    # 1) default path: from_logits=True, odd pixel count -> padded + masked
    loss = jax.block_until_ready(dice_loss(x, y))
    ref = _dice_loss_ref(x, y)
    assert np.allclose(np.asarray(loss), np.asarray(ref), **tol), (loss, ref)

    # 2) ignore_index path (int8 labels + class masking)
    loss_ig = jax.block_until_ready(dice_loss(x, y, ignore_index=1))
    ref_ig = _dice_loss_ref(x, y, ignore_index=1)
    assert np.allclose(np.asarray(loss_ig), np.asarray(ref_ig), **tol), (loss_ig, ref_ig)

    # 3) bf16 logits stay bf16 in HBM; kernel upcasts per slab
    x_bf = x.astype(jnp.bfloat16)
    loss_bf = jax.block_until_ready(dice_loss(x_bf, y))
    ref_bf = _dice_loss_ref(x_bf, y)
    assert np.allclose(np.asarray(loss_bf), np.asarray(ref_bf), **tol), (loss_bf, ref_bf)

    # 4) from_logits=False on precomputed probabilities
    probs = jax.nn.softmax(x, axis=1)
    loss_p = jax.block_until_ready(dice_loss(probs, y, from_logits=False))
    assert np.allclose(np.asarray(loss_p), np.asarray(ref), **tol), (loss_p, ref)

    # 5) aligned pixel count -> no padding, no masking ops
    x2 = jax.random.normal(k3, (B, C, 64, 64), dtype=jnp.float32)
    y2 = jax.random.randint(k4, (B, 64, 64), 0, C, dtype=jnp.int32)
    loss2 = jax.block_until_ready(dice_loss(x2, y2))
    ref2 = _dice_loss_ref(x2, y2)
    assert np.allclose(np.asarray(loss2), np.asarray(ref2), **tol), (loss2, ref2)

    # 6) multi-tile accumulation + 2-way pixel split with B=1 (forced small blocks)
    x3 = jax.random.normal(k3, (1, C, 128, 128), dtype=jnp.float32)
    y3 = jax.random.randint(k4, (1, 128, 128), 0, C, dtype=jnp.int32)
    loss3 = jax.block_until_ready(dice_loss(x3, y3, block_bytes=64 * 1024))
    ref3 = _dice_loss_ref(x3, y3)
    assert np.allclose(np.asarray(loss3), np.asarray(ref3), **tol), (loss3, ref3)

    print("KERNEL_OK")
</pallas_src>

<mosaic_0001>
module attributes {stable_mosaic.version = 11 : i64} {
  func.func @_dice_kernel(%arg0: i32, %arg1: i32, %arg2: i32, %arg3: memref<1x4x32x128xf32, #tpu.memory_space<vmem>>, %arg4: memref<1x32x128xi8, #tpu.memory_space<vmem>>, %arg5: memref<1x1x64x128xf32, #tpu.memory_space<vmem>>, %arg6: memref<64x128xf32, #tpu.memory_space<vmem>>) attributes {dimension_semantics = [#tpu.dimension_semantics<parallel>, #tpu.dimension_semantics<parallel>, #tpu.dimension_semantics<arbitrary>], iteration_bounds = array<i64: 2, 1, 1>, scalar_prefetch = 0 : i64, scratch_operands = 1 : i64, tpu.core_type = #tpu.core_type<tc>, window_params = [{transform_indices = @transform_0, window_bounds = array<i64: 1, 4, 32, 128>}, {transform_indices = @transform_1, window_bounds = array<i64: 1, 32, 128>}, {transform_indices = @transform_2, window_bounds = array<i64: 1, 1, 64, 128>}]} {
    %c0_i32 = arith.constant 0 : i32
    %0 = arith.cmpi eq, %arg2, %c0_i32 : i32
    %1 = arith.extui %0 : i1 to i32
    %c0_i32_0 = arith.constant 0 : i32
    %2 = arith.cmpi ne, %1, %c0_i32_0 : i32
    scf.if %2 {
      %cst_59 = arith.constant 0.000000e+00 : f32
      %118 = vector.broadcast %cst_59 : f32 to vector<64x128xf32>
      %c0_60 = arith.constant 0 : index
      %c0_61 = arith.constant 0 : index
      %119 = vector.load %arg6[%c0_60, %c0_61] : memref<64x128xf32, #tpu.memory_space<vmem>>, vector<64x128xf32>
      tpu.vector_store %arg6[%c0_60, %c0_61], %118 {strides = array<i32>} : memref<64x128xf32, #tpu.memory_space<vmem>>, vector<64x128xf32>,
    } else {
    }
    %c0 = arith.constant 0 : index
    %c0_1 = arith.constant 0 : index
    %c0_2 = arith.constant 0 : index
    %3 = vector.load %arg4[%c0, %c0_1, %c0_2] : memref<1x32x128xi8, #tpu.memory_space<vmem>>, vector<1x32x128xi8>
    %4 = vector.shape_cast %3 : vector<1x32x128xi8> to vector<32x128xi8>
    %5 = arith.extsi %4 : vector<32x128xi8> to vector<32x128xi32>
    %c-1_i32 = arith.constant -1 : i32
    %6 = vector.broadcast %c-1_i32 : i32 to vector<32x128xi32>
    %7 = arith.cmpi ne, %5, %6 : vector<32x128xi32>
    %c0_3 = arith.constant 0 : index
    %c0_4 = arith.constant 0 : index
    %c0_5 = arith.constant 0 : index
    %c0_6 = arith.constant 0 : index
    %8 = vector.load %arg3[%c0_3, %c0_4, %c0_5, %c0_6] : memref<1x4x32x128xf32, #tpu.memory_space<vmem>>, vector<1x1x32x128xf32>
    %9 = vector.shape_cast %8 : vector<1x1x32x128xf32> to vector<32x128xf32>
    %c0_7 = arith.constant 0 : index
    %c1 = arith.constant 1 : index
    %c0_8 = arith.constant 0 : index
    %c0_9 = arith.constant 0 : index
    %10 = vector.load %arg3[%c0_7, %c1, %c0_8, %c0_9] : memref<1x4x32x128xf32, #tpu.memory_space<vmem>>, vector<1x1x32x128xf32>
    %11 = vector.shape_cast %10 : vector<1x1x32x128xf32> to vector<32x128xf32>
    %c0_10 = arith.constant 0 : index
    %c2 = arith.constant 2 : index
    %c0_11 = arith.constant 0 : index
    %c0_12 = arith.constant 0 : index
    %12 = vector.load %arg3[%c0_10, %c2, %c0_11, %c0_12] : memref<1x4x32x128xf32, #tpu.memory_space<vmem>>, vector<1x1x32x128xf32>
    %13 = vector.shape_cast %12 : vector<1x1x32x128xf32> to vector<32x128xf32>
    %c0_13 = arith.constant 0 : index
    %c3 = arith.constant 3 : index
    %c0_14 = arith.constant 0 : index
    %c0_15 = arith.constant 0 : index
    %14 = vector.load %arg3[%c0_13, %c3, %c0_14, %c0_15] : memref<1x4x32x128xf32, #tpu.memory_space<vmem>>, vector<1x1x32x128xf32>
    %15 = vector.shape_cast %14 : vector<1x1x32x128xf32> to vector<32x128xf32>
    %16 = arith.maximumf %9, %11 : vector<32x128xf32>
    %17 = arith.maximumf %16, %13 : vector<32x128xf32>
    %18 = arith.maximumf %17, %15 : vector<32x128xf32>
    %19 = arith.subf %9, %18 : vector<32x128xf32>
    %20 = math.exp %19 : vector<32x128xf32>
    %21 = arith.subf %11, %18 : vector<32x128xf32>
    %22 = math.exp %21 : vector<32x128xf32>
    %23 = arith.subf %13, %18 : vector<32x128xf32>
    %24 = math.exp %23 : vector<32x128xf32>
    %25 = arith.subf %15, %18 : vector<32x128xf32>
    %26 = math.exp %25 : vector<32x128xf32>
    %27 = arith.addf %20, %22 : vector<32x128xf32>
    %28 = arith.addf %27, %24 : vector<32x128xf32>
    %29 = arith.addf %28, %26 : vector<32x128xf32>
    %30 = tpu.reciprocal %29 {approx = true} : vector<32x128xf32> -> vector<32x128xf32>
    %31 = arith.mulf %20, %30 : vector<32x128xf32>
    %32 = arith.mulf %22, %30 : vector<32x128xf32>
    %33 = arith.mulf %24, %30 : vector<32x128xf32>
    %34 = arith.mulf %26, %30 : vector<32x128xf32>
    %c0_i32_16 = arith.constant 0 : i32
    %35 = vector.broadcast %c0_i32_16 : i32 to vector<32x128xi32>
    %36 = arith.cmpi eq, %5, %35 : vector<32x128xi32>
    %37 = arith.andi %36, %7 : vector<32x128xi1>
    %cst = arith.constant 0.000000e+00 : f32
    %38 = vector.broadcast %cst : f32 to vector<32x128xf32>
    %39 = arith.select %7, %31, %38 : vector<32x128xi1>, vector<32x128xf32>
    %40 = arith.extui %37 : vector<32x128xi1> to vector<32x128xi32>
    %41 = arith.sitofp %40 : vector<32x128xi32> to vector<32x128xf32>
    %cst_17 = arith.constant 0.000000e+00 : f32
    %42 = vector.broadcast %cst_17 : f32 to vector<32x128xf32>
    %43 = arith.select %37, %31, %42 : vector<32x128xi1>, vector<32x128xf32>
    %44 = arith.addf %39, %41 : vector<32x128xf32>
    %c0_18 = arith.constant 0 : index
    %c0_19 = arith.constant 0 : index
    %45 = vector.load %arg6[%c0_18, %c0_19] : memref<64x128xf32, #tpu.memory_space<vmem>>, vector<8x128xf32>
    %46 = vector.shape_cast %43 : vector<32x128xf32> to vector<4x8x128xf32>
    %cst_20 = arith.constant dense<0.000000e+00> : vector<8x128xf32>
    %47 = vector.multi_reduction <add>, %46, %cst_20 [0] : vector<4x8x128xf32> to vector<8x128xf32>
    %48 = arith.addf %45, %47 : vector<8x128xf32>
    %c0_21 = arith.constant 0 : index
    %c0_22 = arith.constant 0 : index
    %49 = vector.load %arg6[%c0_21, %c0_22] : memref<64x128xf32, #tpu.memory_space<vmem>>, vector<8x128xf32>
    tpu.vector_store %arg6[%c0_21, %c0_22], %48 {strides = array<i32>} : memref<64x128xf32, #tpu.memory_space<vmem>>, vector<8x128xf32>,
    %c32 = arith.constant 32 : index
    %c0_23 = arith.constant 0 : index
    %50 = vector.load %arg6[%c32, %c0_23] : memref<64x128xf32, #tpu.memory_space<vmem>>, vector<8x128xf32>
    %51 = vector.shape_cast %44 : vector<32x128xf32> to vector<4x8x128xf32>
    %cst_24 = arith.constant dense<0.000000e+00> : vector<8x128xf32>
    %52 = vector.multi_reduction <add>, %51, %cst_24 [0] : vector<4x8x128xf32> to vector<8x128xf32>
    %53 = arith.addf %50, %52 : vector<8x128xf32>
    %c32_25 = arith.constant 32 : index
    %c0_26 = arith.constant 0 : index
    %54 = vector.load %arg6[%c32_25, %c0_26] : memref<64x128xf32, #tpu.memory_space<vmem>>, vector<8x128xf32>
    tpu.vector_store %arg6[%c32_25, %c0_26], %53 {strides = array<i32>} : memref<64x128xf32, #tpu.memory_space<vmem>>, vector<8x128xf32>,
    %c1_i32 = arith.constant 1 : i32
    %55 = vector.broadcast %c1_i32 : i32 to vector<32x128xi32>
    %56 = arith.cmpi eq, %5, %55 : vector<32x128xi32>
    %57 = arith.andi %56, %7 : vector<32x128xi1>
    %cst_27 = arith.constant 0.000000e+00 : f32
    %58 = vector.broadcast %cst_27 : f32 to vector<32x128xf32>
    %59 = arith.select %7, %32, %58 : vector<32x128xi1>, vector<32x128xf32>
    %60 = arith.extui %57 : vector<32x128xi1> to vector<32x128xi32>
    %61 = arith.sitofp %60 : vector<32x128xi32> to vector<32x128xf32>
    %cst_28 = arith.constant 0.000000e+00 : f32
    %62 = vector.broadcast %cst_28 : f32 to vector<32x128xf32>
    %63 = arith.select %57, %32, %62 : vector<32x128xi1>, vector<32x128xf32>
    %64 = arith.addf %59, %61 : vector<32x128xf32>
    %c8 = arith.constant 8 : index
    %c0_29 = arith.constant 0 : index
    %65 = vector.load %arg6[%c8, %c0_29] : memref<64x128xf32, #tpu.memory_space<vmem>>, vector<8x128xf32>
    %66 = vector.shape_cast %63 : vector<32x128xf32> to vector<4x8x128xf32>
    %cst_30 = arith.constant dense<0.000000e+00> : vector<8x128xf32>
    %67 = vector.multi_reduction <add>, %66, %cst_30 [0] : vector<4x8x128xf32> to vector<8x128xf32>
    %68 = arith.addf %65, %67 : vector<8x128xf32>
    %c8_31 = arith.constant 8 : index
    %c0_32 = arith.constant 0 : index
    %69 = vector.load %arg6[%c8_31, %c0_32] : memref<64x128xf32, #tpu.memory_space<vmem>>, vector<8x128xf32>
    tpu.vector_store %arg6[%c8_31, %c0_32], %68 {strides = array<i32>} : memref<64x128xf32, #tpu.memory_space<vmem>>, vector<8x128xf32>,
    %c40 = arith.constant 40 : index
    %c0_33 = arith.constant 0 : index
    %70 = vector.load %arg6[%c40, %c0_33] : memref<64x128xf32, #tpu.memory_space<vmem>>, vector<8x128xf32>
    %71 = vector.shape_cast %64 : vector<32x128xf32> to vector<4x8x128xf32>
    %cst_34 = arith.constant dense<0.000000e+00> : vector<8x128xf32>
    %72 = vector.multi_reduction <add>, %71, %cst_34 [0] : vector<4x8x128xf32> to vector<8x128xf32>
    %73 = arith.addf %70, %72 : vector<8x128xf32>
    %c40_35 = arith.constant 40 : index
    %c0_36 = arith.constant 0 : index
    %74 = vector.load %arg6[%c40_35, %c0_36] : memref<64x128xf32, #tpu.memory_space<vmem>>, vector<8x128xf32>
    tpu.vector_store %arg6[%c40_35, %c0_36], %73 {strides = array<i32>} : memref<64x128xf32, #tpu.memory_space<vmem>>, vector<8x128xf32>,
    %c2_i32 = arith.constant 2 : i32
    %75 = vector.broadcast %c2_i32 : i32 to vector<32x128xi32>
    %76 = arith.cmpi eq, %5, %75 : vector<32x128xi32>
    %77 = arith.andi %76, %7 : vector<32x128xi1>
    %cst_37 = arith.constant 0.000000e+00 : f32
    %78 = vector.broadcast %cst_37 : f32 to vector<32x128xf32>
    %79 = arith.select %7, %33, %78 : vector<32x128xi1>, vector<32x128xf32>
    %80 = arith.extui %77 : vector<32x128xi1> to vector<32x128xi32>
    %81 = arith.sitofp %80 : vector<32x128xi32> to vector<32x128xf32>
    %cst_38 = arith.constant 0.000000e+00 : f32
    %82 = vector.broadcast %cst_38 : f32 to vector<32x128xf32>
    %83 = arith.select %77, %33, %82 : vector<32x128xi1>, vector<32x128xf32>
    %84 = arith.addf %79, %81 : vector<32x128xf32>
    %c16 = arith.constant 16 : index
    %c0_39 = arith.constant 0 : index
    %85 = vector.load %arg6[%c16, %c0_39] : memref<64x128xf32, #tpu.memory_space<vmem>>, vector<8x128xf32>
    %86 = vector.shape_cast %83 : vector<32x128xf32> to vector<4x8x128xf32>
    %cst_40 = arith.constant dense<0.000000e+00> : vector<8x128xf32>
    %87 = vector.multi_reduction <add>, %86, %cst_40 [0] : vector<4x8x128xf32> to vector<8x128xf32>
    %88 = arith.addf %85, %87 : vector<8x128xf32>
    %c16_41 = arith.constant 16 : index
    %c0_42 = arith.constant 0 : index
    %89 = vector.load %arg6[%c16_41, %c0_42] : memref<64x128xf32, #tpu.memory_space<vmem>>, vector<8x128xf32>
    tpu.vector_store %arg6[%c16_41, %c0_42], %88 {strides = array<i32>} : memref<64x128xf32, #tpu.memory_space<vmem>>, vector<8x128xf32>,
    %c48 = arith.constant 48 : index
    %c0_43 = arith.constant 0 : index
    %90 = vector.load %arg6[%c48, %c0_43] : memref<64x128xf32, #tpu.memory_space<vmem>>, vector<8x128xf32>
    %91 = vector.shape_cast %84 : vector<32x128xf32> to vector<4x8x128xf32>
    %cst_44 = arith.constant dense<0.000000e+00> : vector<8x128xf32>
    %92 = vector.multi_reduction <add>, %91, %cst_44 [0] : vector<4x8x128xf32> to vector<8x128xf32>
    %93 = arith.addf %90, %92 : vector<8x128xf32>
    %c48_45 = arith.constant 48 : index
    %c0_46 = arith.constant 0 : index
    %94 = vector.load %arg6[%c48_45, %c0_46] : memref<64x128xf32, #tpu.memory_space<vmem>>, vector<8x128xf32>
    tpu.vector_store %arg6[%c48_45, %c0_46], %93 {strides = array<i32>} : memref<64x128xf32, #tpu.memory_space<vmem>>, vector<8x128xf32>,
    %c3_i32 = arith.constant 3 : i32
    %95 = vector.broadcast %c3_i32 : i32 to vector<32x128xi32>
    %96 = arith.cmpi eq, %5, %95 : vector<32x128xi32>
    %97 = arith.andi %96, %7 : vector<32x128xi1>
    %cst_47 = arith.constant 0.000000e+00 : f32
    %98 = vector.broadcast %cst_47 : f32 to vector<32x128xf32>
    %99 = arith.select %7, %34, %98 : vector<32x128xi1>, vector<32x128xf32>
    %100 = arith.extui %97 : vector<32x128xi1> to vector<32x128xi32>
    %101 = arith.sitofp %100 : vector<32x128xi32> to vector<32x128xf32>
    %cst_48 = arith.constant 0.000000e+00 : f32
    %102 = vector.broadcast %cst_48 : f32 to vector<32x128xf32>
    %103 = arith.select %97, %34, %102 : vector<32x128xi1>, vector<32x128xf32>
    %104 = arith.addf %99, %101 : vector<32x128xf32>
    %c24 = arith.constant 24 : index
    %c0_49 = arith.constant 0 : index
    %105 = vector.load %arg6[%c24, %c0_49] : memref<64x128xf32, #tpu.memory_space<vmem>>, vector<8x128xf32>
    %106 = vector.shape_cast %103 : vector<32x128xf32> to vector<4x8x128xf32>
    %cst_50 = arith.constant dense<0.000000e+00> : vector<8x128xf32>
    %107 = vector.multi_reduction <add>, %106, %cst_50 [0] : vector<4x8x128xf32> to vector<8x128xf32>
    %108 = arith.addf %105, %107 : vector<8x128xf32>
    %c24_51 = arith.constant 24 : index
    %c0_52 = arith.constant 0 : index
    %109 = vector.load %arg6[%c24_51, %c0_52] : memref<64x128xf32, #tpu.memory_space<vmem>>, vector<8x128xf32>
    tpu.vector_store %arg6[%c24_51, %c0_52], %108 {strides = array<i32>} : memref<64x128xf32, #tpu.memory_space<vmem>>, vector<8x128xf32>,
    %c56 = arith.constant 56 : index
    %c0_53 = arith.constant 0 : index
    %110 = vector.load %arg6[%c56, %c0_53] : memref<64x128xf32, #tpu.memory_space<vmem>>, vector<8x128xf32>
    %111 = vector.shape_cast %104 : vector<32x128xf32> to vector<4x8x128xf32>
    %cst_54 = arith.constant dense<0.000000e+00> : vector<8x128xf32>
    %112 = vector.multi_reduction <add>, %111, %cst_54 [0] : vector<4x8x128xf32> to vector<8x128xf32>
    %113 = arith.addf %110, %112 : vector<8x128xf32>
    %c56_55 = arith.constant 56 : index
    %c0_56 = arith.constant 0 : index
    %114 = vector.load %arg6[%c56_55, %c0_56] : memref<64x128xf32, #tpu.memory_space<vmem>>, vector<8x128xf32>
    tpu.vector_store %arg6[%c56_55, %c0_56], %113 {strides = array<i32>} : memref<64x128xf32, #tpu.memory_space<vmem>>, vector<8x128xf32>,
    %c0_i32_57 = arith.constant 0 : i32
    %115 = arith.cmpi eq, %arg2, %c0_i32_57 : i32
    %116 = arith.extui %115 : i1 to i32
    %c0_i32_58 = arith.constant 0 : i32
    %117 = arith.cmpi ne, %116, %c0_i32_58 : i32
    scf.if %117 {
      %c0_59 = arith.constant 0 : index
      %c0_60 = arith.constant 0 : index
      %118 = vector.load %arg6[%c0_59, %c0_60] : memref<64x128xf32, #tpu.memory_space<vmem>>, vector<64x128xf32>
      %c0_61 = arith.constant 0 : index
      %c0_62 = arith.constant 0 : index
      %c0_63 = arith.constant 0 : index
      %c0_64 = arith.constant 0 : index
      %119 = vector.load %arg5[%c0_61, %c0_62, %c0_63, %c0_64] : memref<1x1x64x128xf32, #tpu.memory_space<vmem>>, vector<1x1x64x128xf32>
      %120 = vector.shape_cast %119 : vector<1x1x64x128xf32> to vector<64x128xf32>
      %121 = vector.shape_cast %118 : vector<64x128xf32> to vector<1x1x64x128xf32>
      tpu.vector_store %arg5[%c0_61, %c0_62, %c0_63, %c0_64], %121 {strides = array<i32>} : memref<1x1x64x128xf32, #tpu.memory_space<vmem>>, vector<1x1x64x128xf32>,
    } else {
    }
    return
  }
  func.func @transform_0(%arg0: i32, %arg1: i32, %arg2: i32) -> (i32, i32, i32, i32) {
    %c1_i32 = arith.constant 1 : i32
    %0 = arith.muli %arg1, %c1_i32 : i32
    %1 = arith.addi %0, %arg2 : i32
    %c0_i32 = arith.constant 0 : i32
    %c0_i32_0 = arith.constant 0 : i32
    %c0_i32_1 = arith.constant 0 : i32
    return %arg0, %c0_i32, %1, %c0_i32_0 : i32, i32, i32, i32
  }
  func.func @transform_1(%arg0: i32, %arg1: i32, %arg2: i32) -> (i32, i32, i32) {
    %c1_i32 = arith.constant 1 : i32
    %0 = arith.muli %arg1, %c1_i32 : i32
    %1 = arith.addi %0, %arg2 : i32
    %c0_i32 = arith.constant 0 : i32
    %c0_i32_0 = arith.constant 0 : i32
    return %arg0, %1, %c0_i32 : i32, i32, i32
  }
  func.func @transform_2(%arg0: i32, %arg1: i32, %arg2: i32) -> (i32, i32, i32, i32) {
    %c0_i32 = arith.constant 0 : i32
    %c0_i32_0 = arith.constant 0 : i32
    %c0_i32_1 = arith.constant 0 : i32
    return %arg0, %arg1, %c0_i32, %c0_i32_0 : i32, i32, i32, i32
  }
}

</mosaic_0001>

<bundles_post_ra>
// kernel: tpu_custom_call.1
= control target key start
LH: loop header
LB: loop body
LE: loop exit
PB: predicated region body
PF: predicated region fallthrough
CT: control target
= control target key end

     0   :  { %7 = vsyncpa [#allocation4], 0  ;;  %s1536_s0 = inlined_call_operand.hbm [shape: f32[2,4,32,128], index: 0, kind: input, shape index: {}]   ;;  %s1537_s1 = inlined_call_operand.hbm [shape: s8[2,32,128], index: 1, kind: input, shape index: {}]   ;;  %s1538_s2 = inlined_call_operand.hbm [shape: f32[2,1,64,128], index: 2, kind: output, shape index: {}]  }
   0x1   :  { %9 = vsyncpa [#allocation4 + $0x1], 0 }
   0x2   :  { %10 = vsyncpa [#allocation7], 0 }
   0x3   :  { %12 = vsyncpa [#allocation7 + $0x1], 0 }
   0x4   :  { %13 = vsyncpa [#allocation5], 0 }
   0x5   :  { %15 = vsyncpa [#allocation5 + $0x1], 0  ;;  %s1013_s9 = smov 0   ;;  %s1015_s10 = smov 0  }
   0x6   :  { %s1017_s11 = smov 0   ;;  %s1019_s12 = smov 0  }
   0x7   :  { %s1021_s13 = smov 0   ;;  %s1023_s14 = smov 0  }
   0x8 LB: > { %s685_s15 = sadd.s32 4294967295, %s991_s14   ;;  %s686_s16 = sadd.s32 4294967294, %s991_s14   ;;  %s991_s14 = sphi %s1023_s14, %s21_s14   ;;  %s987_s13 = sphi %s1021_s13, %s1619_s13   ;;  %s983_s12 = sphi %s1019_s12, %s1618_s12   ;;  %s979_s11 = sphi %s1017_s11, %s1617_s11   ;;  %s975_s10 = sphi %s1015_s10, %s1616_s10   ;;  %s971_s9 = sphi %s1013_s9, %s1615_s9  }
   0x9   : > { %s40_s17 = sadd.s32 1, %s987_s13  ;;  %s51_s18 = sadd.s32 1, %s979_s11 }
   0xa   : > { %p42_p0 = scmp.ge.s32.totalorder %s40_s17, 2  ;;  %p58_p1 = scmp.ne.s32.totalorder %s979_s11, %s975_s10 }
   0xb   : > { %p59_p2 = scmp.eq.s32.totalorder %s991_s14, 0  ;;  %p64_p3 = scmp.ne.s32.totalorder %s975_s10, %s971_s9 }
   0xc   : > { %s1621_s17 = smov (%p42_p0, %s40_s17), 0  ;;  %p65_p5 = scmp.eq.s32.totalorder %s685_s15, 0 }
   0xd   : > { %p1054_p4 = por %p59_p2, %p58_p1  ;;  %s46_s20 = ssub.s32 %s987_s13, %s1621_s17 }
   0xe   : > { %p120_p6 = scmp.eq.s32.totalorder %s685_s15, 1  ;;  %p49_p7 = scmp.eq.s32.totalorder %s46_s20, 0 }
   0xf   : > { %p1060_p8 = por %p65_p5, %p64_p3  ;;  %p126_p10 = scmp.eq.s32.totalorder %s686_s16, 1 }
  0x10   : > { %p1064_p9 = por %p120_p6, %p58_p1  ;;  %p688_p12 = scmp.ge.s32.totalorder %s991_s14, 2 }
  0x11   : > { %s1069_s23 = scalar_select %p49_p7, %s979_s11, %s51_s18  }
  0x12   : > { %p1071_p11 = por %p126_p10, %p64_p3  ;;  %p750_p13 = scmp.lt.s32.totalorder %s991_s14, 2 }
  0x13   : > { %s146_s25 = sand.u32 1, %s979_s11   ;;  %s731_s27 = sshll.u32 %s987_s13, 7 }
  0x14   : > { %s689_s26 = sshll.u32 %s146_s25, 7  ;;  %s158_s30 = scalar_lea.hbm %s1536_s0, %s731_s27 }
  0x15   : > { %s150_s3 = scalar_lea.vmem [#allocation3], %s689_s26  ;;  %s159_s5 = sshll.u32 %s158_s30, 4  ;;  %s160_s5 = int_to_ptr.hbm [resolvable:$true] %s159_s5 }
  0x16   : > { %s161_s4 = sshll.u32 %s150_s3, 4  ;;  %p1084_p0 = pnand %p750_p13, %p1054_p4  ;;  %s162_s4 = int_to_ptr.vmem [resolvable:$true] %s161_s4 }
  0x17   : > { %p694_p1 = scmp.ge.s32.totalorder %s991_s14, 1  ;;  %s147_s7 = scalar_lea.sflag [#allocation4], %s146_s25 }
  0x18   : > { %s993_s8 = smov 128   ;;  %s994_s15 = smov 8  }
  0x19   : > { %742 = dma.hbm_to_vmem [thread:$0]  (!%p1084_p0), %s160_s5, 2048, %s162_s4, %s147_s7, %s993_s8, %s993_s8, %s994_s15  }
  0x1a   : > { %p190_p2 = scmp.lt.s32.totalorder %s991_s14, 3  ;;  %s692_s16 = sshll.u32 %s146_s25, 3 }
  0x1b   : > { %s693_s18 = sshll.u32 %s987_s13, 3  ;;  %s175_s27 = scalar_lea.vmem [#allocation6], %s692_s16 }
  0x1c   : > { %p191_p3 = pnand %p694_p1, %p190_p2  ;;  %s181_s19 = scalar_lea.hbm %s1537_s1, %s693_s18 }
  0x1d   : > { %s185_s28 = sshll.u32 %s175_s27, 4  ;;  %s183_s29 = sshll.u32 %s181_s19, 4  ;;  %s186_s28 = int_to_ptr.vmem [resolvable:$true] %s185_s28  ;;  %s184_s29 = int_to_ptr.hbm [resolvable:$true] %s183_s29 }
  0x1e   : > { %s172_s30 = scalar_lea.sflag [#allocation7], %s146_s25  ;;  %194 = sbr.rel (%p191_p3) target bundleno = 112 (0x70), region = 28 }
  0x1f   : > { %745 = dma.hbm_to_vmem [thread:$0]  (!%p1084_p0), %s184_s29, 128, %s186_s28, %s172_s30  }
  0x20   : > { %s1099_s3 = sand.u32 (!%p191_p3), 1, %s975_s10  }
  0x21   : > { %s695_s4 = sshll.u32 (!%p191_p3), %s1099_s3, 7  ;;  %s197_s5 = scalar_lea.sflag (!%p191_p3), [#allocation4], %s1099_s3 }
  0x22   : > { %s200_s7 = scalar_lea.vmem (!%p191_p3), [#allocation3], %s695_s4 }
  0x23   : > { %958 = dma.done.wait (%p1060_p8), %s197_s5, 2048  }
  0x24   : > { %960 = vsyncadd (%p1060_p8), %s197_s5, 4294965248  ;;  %s696_s25 = sshll.u32 %s1099_s3, 3  ;;  %s207_s6 = scalar_lea.sflag [#allocation7], %s1099_s3 }
  0x25   : > { %s1109_s8 = scalar_lea.vmem [#allocation6], %s696_s25 }
  0x26   : > { %962 = dma.done.wait (%p1060_p8), %s207_s6, 128  }
  0x27   : > { %964 = vsyncadd (%p1060_p8), %s207_s6, 4294967168  ;;  %v261_v0 = vld [vmem:[%s200_s7] sm:$0xff]  ;;  %v262_v1 = vld [vmem:[%s200_s7 + $0x8] sm:$0xff]  ;;  %s697_s21 = sshll.u32 %s1099_s3, 6  ;;  %s732_s16 = sshll.u32 %s983_s12, 6 }
  0x28   : > { %v263_v2 = vld [vmem:[%s200_s7 + $0x10] sm:$0xff]  ;;  %v264_v3 = vld [vmem:[%s200_s7 + $0x18] sm:$0xff]  ;;  %v698_v4 = vld [vmem:[%s200_s7 + $0x20] sm:$0xff]  ;;  %s1435_s15 = scalar_lea.vmem [#allocation8], %s697_s21  ;;  %s565_s20 = scalar_lea.hbm %s1538_s2, %s732_s16 }
  0x29   : > { %v699_v5 = vld [vmem:[%s200_s7 + $0x28] sm:$0xff]  ;;  %v700_v6 = vld [vmem:[%s200_s7 + $0x30] sm:$0xff]  ;;  %v701_v7 = vld [vmem:[%s200_s7 + $0x38] sm:$0xff]  ;;  %v280_v8 = vmax.f32 %v261_v0, %v698_v4  ;;  %s566_s26 = sshll.u32 %s1435_s15, 4  ;;  %s568_s19 = sshll.u32 %s565_s20, 4  ;;  %s567_s26 = int_to_ptr.vmem [resolvable:$true] %s566_s26  ;;  %s569_s19 = int_to_ptr.hbm [resolvable:$true] %s568_s19 }
  0x2a   : > { %v702_v9 = vld [vmem:[%s200_s7 + $0x40] sm:$0xff]  ;;  %v703_v10 = vld [vmem:[%s200_s7 + $0x48] sm:$0xff]  ;;  %v704_v11 = vld [vmem:[%s200_s7 + $0x50] sm:$0xff]  ;;  %v281_v14 = vmax.f32 %v262_v1, %v699_v5  ;;  %v282_v15 = vmax.f32 %v263_v2, %v700_v6  ;;  %v283_v16 = vmax.f32 %v264_v3, %v701_v7  ;;  %s552_s27 = scalar_lea.sflag [#allocation5], %s1099_s3  ;;  %s919_s28 = sshra.s32 %s569_s19, 4  ;;  %s920_s28 = int_to_ptr.hbm [resolvable:$true] %s919_s28 }
  0x2b   : > { %v705_v12 = vld [vmem:[%s200_s7 + $0x58] sm:$0xff]  ;;  %v1115_v13 = vld [vmem:[%s200_s7 + $0x60] sm:$0xff]  ;;  %v284_v17 = vmax.f32 %v280_v8, %v702_v9  ;;  %v1117_v18 = vld [vmem:[%s200_s7 + $0x68] sm:$0xff]  ;;  %s921_s29 = scalar_lea.hbm %s920_s28, 64  ;;  %s925_s5 = scalar_lea.hbm %s1538_s2, 128 }
  0x2c   : > { %v1119_v19 = vld [vmem:[%s200_s7 + $0x70] sm:$0xff]  ;;  %v1121_v20 = vld [vmem:[%s200_s7 + $0x78] sm:$0xff]  ;;  %v285_v21 = vmax.f32 %v281_v14, %v703_v10  ;;  %v286_v22 = vmax.f32 %v282_v15, %v704_v11  ;;  %v287_v23 = vmax.f32 %v283_v16, %v705_v12  ;;  %v252_v31 = vld [vmem:[%s1109_s8] sm:$0xff]  ;;  %p922_p4 = scmp.ne.s32.totalorder %s920_s28, %s921_s29  ;;  %p926_p7 = scmp.lt.s32.totalorder %s920_s28, %s1538_s2 }
  0x2d   : > { %v288_v24 = vmax.f32 %v284_v17, %v1115_v13  ;;  %v1128_v43 = vunpack.c.0.s8 %v252_v31  ;;  %v1130_v44 = vunpack.c.1.s8 %v252_v31  ;;  %v1132_v49 = vunpack.c.2.s8 %v252_v31  ;;  %p927_p8 = scmp.lt.s32.totalorder %s925_s5, %s921_s29 }
  0x2e   : > { %v289_v25 = vmax.f32 %v285_v21, %v1117_v18  ;;  %v290_v26 = vmax.f32 %v286_v22, %v1119_v19  ;;  %v291_v27 = vmax.f32 %v287_v23, %v1121_v20  ;;  %v1134_v52 = vunpack.c.3.s8 %v252_v31  ;;  %p923_p5 = pnand %p922_p4, %p1064_p9 }
  0x2f   : > { %v292_v28 = vsub.f32 %v261_v0, %v288_v24  ;;  %v304_v29 = vsub.f32 %v698_v4, %v288_v24  ;;  %v316_v30 = vsub.f32 %v702_v9, %v288_v24  ;;  %v328_v54 = vsub.f32 %v1115_v13, %v288_v24  ;;  %p928_p10 = por %p927_p8, %p926_p7 }
  0x30   : > { %v293_v32 = vsub.f32 %v262_v1, %v289_v25  ;;  %v294_v33 = vsub.f32 %v263_v2, %v290_v26  ;;  %v295_v34 = vsub.f32 %v264_v3, %v291_v27  ;;  %v305_v36 = vsub.f32 %v699_v5, %v289_v25  ;;  %p924_p6 = pneg %p923_p5 }
  0x31   : > { %v296_v35 = vmul.f32 1.442695, %v292_v28  ;;  %v306_v37 = vsub.f32 %v700_v6, %v290_v26  ;;  %v307_v38 = vsub.f32 %v701_v7, %v291_v27  ;;  %v308_v39 = vmul.f32 1.442695, %v304_v29 }
  0x32   : > { %v298_v40 = vmul.f32 1.442695, %v293_v32  ;;  %v300_v41 = vmul.f32 1.442695, %v294_v33  ;;  %v302_v42 = vmul.f32 1.442695, %v295_v34  ;;  %v317_v47 = vsub.f32 %v703_v10, %v289_v25  ;;  %p929_p13 = pnand %p928_p10, %p924_p6 }
  0x33   : > { %805 = vpow2.f32 %v296_v35  ;;  %v310_v45 = vmul.f32 1.442695, %v305_v36  ;;  %v312_v46 = vmul.f32 1.442695, %v306_v37  ;;  %v318_v48 = vsub.f32 %v704_v11, %v290_v26 }
  0x34   : > { %807 = vpow2.f32 %v308_v39  ;;  %v314_v50 = vmul.f32 1.442695, %v307_v38  ;;  %v319_v51 = vsub.f32 %v705_v12, %v291_v27  ;;  %v320_v53 = vmul.f32 1.442695, %v316_v30 }
  0x35   : > { %809 = vpow2.f32 %v298_v40  ;;  %v322_v55 = vmul.f32 1.442695, %v317_v47  ;;  %v329_v56 = vsub.f32 %v1117_v18, %v289_v25  ;;  %v330_v57 = vsub.f32 %v1119_v19, %v290_v26 }
  0x36   : > { %811 = vpow2.f32 %v300_v41  ;;  %vm1545_vm0 = vcmp.ne.s32.totalorder %v1128_v43, 4294967295  ;;  %v324_v59 = vmul.f32 1.442695, %v318_v48  ;;  %v331_v60 = vsub.f32 %v1121_v20, %v291_v27 }
  0x37   : > { %813 = vpow2.f32 %v302_v42  ;;  %vm1539_vm1 = vcmp.ne.s32.totalorder %v1130_v44, 4294967295  ;;  %vm1540_vm2 = vcmp.ne.s32.totalorder %v1132_v49, 4294967295  ;;  %v326_v62 = vmul.f32 1.442695, %v319_v51 }
  0x38   : > { %815 = vpow2.f32 %v310_v45  ;;  %vm1541_vm3 = vcmp.ne.s32.totalorder %v1134_v52, 4294967295  ;;  %v332_v0 = vmul.f32 1.442695, %v328_v54  ;;  %vm372_vm4 = vcmp.eq.s32.totalorder %v1128_v43, 0 }
  0x39   : > { %v1139_v58 = vpop.eup %805  ;;  %817 = vpow2.f32 %v312_v46  ;;  %v334_v2 = vmul.f32 1.442695, %v329_v56  ;;  %v336_v3 = vmul.f32 1.442695, %v330_v57  ;;  %vm373_vm5 = vcmp.eq.s32.totalorder %v1130_v44, 0  ;;  %vm1172_vm10 = vmand %vm372_vm4, %vm1545_vm0 }
  0x3a   : > { %v1143_v61 = vpop.eup %807  ;;  %819 = vpow2.f32 %v314_v50  ;;  %v338_v5 = vmul.f32 1.442695, %v331_v60  ;;  %vm374_vm6 = vcmp.eq.s32.totalorder %v1132_v49, 0  ;;  %vm375_vm7 = vcmp.eq.s32.totalorder %v1134_v52, 0  ;;  %vm1185_vm12 = vmand %vm373_vm5, %vm1539_vm1 }
  0x3b   : > { %v1147_v63 = vpop.eup %809  ;;  %821 = vpow2.f32 %v320_v53  ;;  %v340_v7 = vadd.f32 %v1143_v61, %v1139_v58  ;;  %vm412_vm8 = vcmp.eq.s32.totalorder %v1128_v43, 1  ;;  %vm413_vm9 = vcmp.eq.s32.totalorder %v1130_v44, 1  ;;  %vm1193_vm13 = vmand %vm374_vm6, %vm1540_vm2 }
  0x3c   : > { %v1151_v1 = vpop.eup %811  ;;  %823 = vpow2.f32 %v322_v55  ;;  %vm414_vm11 = vcmp.eq.s32.totalorder %v1132_v49, 1  ;;  %vm1201_vm14 = vmand %vm375_vm7, %vm1541_vm3  ;;  %vm415_vm15 = vcmp.eq.s32.totalorder %v1134_v52, 1  ;;  %v1564_v19 = vmov 0 }
  0x3d   : > { %v1154_v4 = vpop.eup %813  ;;  %825 = vpow2.f32 %v324_v59  ;;  %vm1214_vm4 = vmand %vm412_vm8, %vm1545_vm0  ;;  %vm452_vm6 = vcmp.eq.s32.totalorder %v1128_v43, 2  ;;  %v1566_v22 = vmov 0  ;;  %vm453_vm8 = vcmp.eq.s32.totalorder %v1130_v44, 2 }
  0x3e   : > { %v1158_v6 = vpop.eup %815  ;;  %827 = vpow2.f32 %v326_v62  ;;  %vm1222_vm5 = vmand %vm413_vm9, %vm1539_vm1  ;;  %v1568_v25 = vmov 0  ;;  %vm454_vm1 = vcmp.eq.s32.totalorder %v1132_v49, 2  ;;  %v1573_v31 = vmov 0 }
  0x3f   : > { %v1164_v8 = vpop.eup %817  ;;  %829 = vpow2.f32 %v332_v0  ;;  %v341_v9 = vadd.f32 %v1158_v6, %v1147_v63  ;;  %v1565_v19 = vsel %vm1222_vm5, 4294967295, %v1564_v19  ;;  %vm1234_vm7 = vmand %vm414_vm11, %vm1540_vm2  ;;  %vm455_vm11 = vcmp.eq.s32.totalorder %v1134_v52, 2 }
  0x40   : > { %v1177_v11 = vpop.eup %819  ;;  %831 = vpow2.f32 %v334_v2  ;;  %v342_v12 = vadd.f32 %v1164_v8, %v1151_v1  ;;  %v1567_v22 = vsel %vm1234_vm7, 4294967295, %v1566_v22  ;;  %vm1244_vm9 = vmand %vm415_vm15, %vm1541_vm3  ;;  %vm1572_vm15 = vcmp.ne.s32.totalorder %v1130_v44, 4294967295 }
  0x41   : > { %v1206_v16 = vpop.eup %821  ;;  %833 = vpow2.f32 %v336_v3  ;;  %v343_v17 = vadd.f32 %v1177_v11, %v1154_v4  ;;  %v1569_v25 = vsel %vm1244_vm9, 4294967295, %v1568_v25  ;;  %vm1255_vm2 = vmand %vm452_vm6, %vm1545_vm0  ;;  %vm492_vm9 = vcmp.eq.s32.totalorder %v1128_v43, 3 }
  0x42   : > { %v1227_v20 = vpop.eup %823  ;;  %835 = vpow2.f32 %v338_v5  ;;  %v344_v21 = vadd.f32 %v1206_v16, %v340_v7  ;;  %vm1262_vm3 = vmand %vm453_vm8, %vm1572_vm15  ;;  %vm1575_vm7 = vcmp.ne.s32.totalorder %v1132_v49, 4294967295  ;;  %v1576_v34 = vmov 0 }
  0x43   : > { %v1239_v23 = vpop.eup %825  ;;  %v345_v24 = vadd.f32 %v1227_v20, %v341_v9  ;;  %v1574_v31 = vsel %vm1262_vm3, 4294967295, %v1573_v31  ;;  %vm1269_vm5 = vmand %vm454_vm1, %vm1575_vm7  ;;  %vm493_vm6 = vcmp.eq.s32.totalorder %v1130_v44, 3  ;;  %vm1578_vm8 = vcmp.ne.s32.totalorder %v1134_v52, 4294967295 }
  0x44   : > { %v1249_v26 = vpop.eup %827  ;;  %v346_v27 = vadd.f32 %v1239_v23, %v342_v12  ;;  %v1577_v34 = vsel %vm1269_vm5, 4294967295, %v1576_v34  ;;  %vm1278_vm15 = vmand %vm455_vm11, %vm1578_vm8  ;;  %v1579_v37 = vmov 0  ;;  %vm494_vm0 = vcmp.eq.s32.totalorder %v1132_v49, 3 }
  0x45   : > { %v830_v29 = vpop.eup %829  ;;  %v347_v30 = vadd.f32 %v1249_v26, %v343_v17  ;;  %v1580_v37 = vsel %vm1278_vm15, 4294967295, %v1579_v37  ;;  %vm495_vm1 = vcmp.eq.s32.totalorder %v1134_v52, 3  ;;  %vm1581_vm7 = vcmp.ne.s32.totalorder %v1128_v43, 4294967295 }
  0x46   : > { %v832_v32 = vpop.eup %831  ;;  %v348_v33 = vadd.f32 %v830_v29, %v344_v21  ;;  %vm1289_vm5 = vmand %vm492_vm9, %vm1581_vm7  ;;  %vm1584_vm11 = vcmp.ne.s32.totalorder %v1130_v44, 4294967295  ;;  %vm1587_vm15 = vcmp.ne.s32.totalorder %v1132_v49, 4294967295  ;;  %v995_v46 = vmov 0.0  }
  0x47   : > { %v1274_v35 = vpop.eup %833  ;;  %v349_v36 = vadd.f32 %v832_v32, %v345_v24  ;;  %vm1296_vm8 = vmand %vm493_vm6, %vm1584_vm11  ;;  %v1308_v47 = vsel %vm1172_vm10, 1.0, %v995_v46  ;;  %vm1590_vm9 = vcmp.ne.s32.totalorder %v1134_v52, 4294967295  ;;  %v1318_v50 = vsel %vm1185_vm12, 1.0, %v995_v46 }
  0x48   : > { %v1283_v38 = vpop.eup %835  ;;  %v350_v39 = vadd.f32 %v1274_v35, %v346_v27  ;;  %837 = vrcp.f32 %v348_v33  ;;  %vm1302_vm3 = vmand %vm494_vm0, %vm1587_vm15  ;;  %v1322_v51 = vsel %vm1193_vm13, 1.0, %v995_v46  ;;  %v1326_v53 = vsel %vm1201_vm14, 1.0, %v995_v46 }
  0x49   : > { %v351_v41 = vadd.f32 %v1283_v38, %v347_v30  ;;  %839 = vrcp.f32 %v349_v36  ;;  %vm1312_vm7 = vmand %vm495_vm1, %vm1590_vm9  ;;  %v1330_v54 = vsel %vm1214_vm4, 1.0, %v995_v46  ;;  %vm1593_vm0 = vnez %v1565_v19 }
  0x4a   : > { %841 = vrcp.f32 %v350_v39  ;;  %v1334_v55 = vsel %vm1593_vm0, 1.0, %v995_v46  ;;  %vm1594_vm6 = vnez %v1567_v22  ;;  %vm1595_vm15 = vnez %v1569_v25 }
  0x4b   : > { %843 = vrcp.f32 %v351_v41  ;;  %v1338_v56 = vsel %vm1594_vm6, 1.0, %v995_v46  ;;  %v1342_v57 = vsel %vm1595_vm15, 1.0, %v995_v46  ;;  %v1346_v59 = vsel %vm1255_vm2, 1.0, %v995_v46 }
  0x4c   : > { %vm1596_vm1 = vnez %v1574_v31  ;;  %vm1597_vm11 = vnez %v1577_v34  ;;  %vm1598_vm9 = vnez %v1580_v37  ;;  %v1362_v3 = vsel %vm1289_vm5, 1.0, %v995_v46 }
  0x4d   : > { %v1350_v60 = vsel %vm1596_vm1, 1.0, %v995_v46  ;;  %v1354_v62 = vsel %vm1597_vm11, 1.0, %v995_v46  ;;  %v1358_v0 = vsel %vm1598_vm9, 1.0, %v995_v46  ;;  %v1366_v5 = vsel %vm1296_vm8, 1.0, %v995_v46 }
  0x4e   : > { %v838_v2 = vpop.eup %837  ;;  %v1370_v7 = vsel %vm1302_vm3, 1.0, %v995_v46  ;;  %v1374_v9 = vsel %vm1312_vm7, 1.0, %v995_v46 }
  0x4f   : > { %v840_v12 = vpop.eup %839  ;;  %v356_v17 = vmul.f32 %v838_v2, %v1139_v58  ;;  %v360_v21 = vmul.f32 %v838_v2, %v1143_v61  ;;  %v1379_v24 = vmul.f32 %v838_v2, %v1206_v16  ;;  %v1381_v27 = vmul.f32 %v838_v2, %v830_v29 }
  0x50   : > { %v842_v30 = vpop.eup %841  ;;  %v357_v33 = vmul.f32 %v840_v12, %v1147_v63  ;;  %v361_v36 = vmul.f32 %v840_v12, %v1158_v6  ;;  %v1386_v39 = vmul.f32 %v840_v12, %v1227_v20  ;;  %v1388_v41 = vmul.f32 %v840_v12, %v832_v32 }
  0x51   : > { %v844_v46 = vpop.eup %843  ;;  %v358_v58 = vmul.f32 %v842_v30, %v1151_v1  ;;  %v392_v61 = vsel %vm1172_vm10, %v356_v17, 0.0  ;;  %v362_v16 = vmul.f32 %v842_v30, %v1164_v8  ;;  %v432_v29 = vsel %vm1214_vm4, %v360_v21, 0.0 }
  0x52   : > { %v359_v63 = vmul.f32 %v844_v46, %v1154_v4  ;;  %v393_v6 = vsel %vm1185_vm12, %v357_v33, 0.0  ;;  %v363_v20 = vmul.f32 %v844_v46, %v1177_v11  ;;  %v433_v32 = vsel %vm1593_vm0, %v361_v36, 0.0 }
  0x53   : > { %v394_v1 = vsel %vm1193_vm13, %v358_v58, 0.0  ;;  %v401_v10 = vadd.f32 %v393_v6, %v392_v61  ;;  %v434_v8 = vsel %vm1594_vm6, %v362_v16, 0.0  ;;  %v441_v18 = vadd.f32 %v433_v32, %v432_v29 }
  0x54   : > { %v395_v4 = vsel %vm1201_vm14, %v359_v63, 0.0  ;;  %v435_v13 = vsel %vm1595_vm15, %v363_v20, 0.0  ;;  %v366_v11 = vmul.f32 %v842_v30, %v1239_v23  ;;  %v367_v19 = vmul.f32 %v844_v46, %v1249_v26 }
  0x55   : > { %v402_v2 = vadd.f32 %v401_v10, %v394_v1  ;;  %v442_v12 = vadd.f32 %v441_v18, %v434_v8  ;;  %v472_v14 = vsel %vm1255_vm2, %v1379_v24, 0.0  ;;  %v473_v22 = vsel %vm1596_vm1, %v1386_v39, 0.0 }
  0x56   : > { %v474_v15 = vsel %vm1597_vm11, %v366_v11, 0.0  ;;  %v475_v25 = vsel %vm1598_vm9, %v367_v19, 0.0  ;;  %v481_v61 = vadd.f32 %v473_v22, %v472_v14  ;;  %v370_v23 = vmul.f32 %v842_v30, %v1274_v35 }
  0x57   : > { %v403_v26 = vadd.f32 %v402_v2, %v395_v4  ;;  %v443_v29 = vadd.f32 %v442_v12, %v435_v13  ;;  %v371_v6 = vmul.f32 %v844_v46, %v1283_v38  ;;  %v512_v28 = vsel %vm1289_vm5, %v1381_v27, 0.0 }
  0x58   : > { %v482_v32 = vadd.f32 %v481_v61, %v474_v15  ;;  %v513_v31 = vsel %vm1296_vm8, %v1388_v41, 0.0  ;;  %v514_v34 = vsel %vm1302_vm3, %v370_v23, 0.0  ;;  %vm1599_vm2 = vcmp.ne.s32.totalorder %v1128_v43, 4294967295 }
  0x59   : > { %v380_v37 = vsel %vm1599_vm2, %v356_v17, 0.0  ;;  %543 = vst [vmem:[%s1435_s15] sm:$0xff] %v403_v26  ;;  %v515_v35 = vsel %vm1312_vm7, %v371_v6, 0.0  ;;  %v521_v38 = vadd.f32 %v513_v31, %v512_v28  ;;  %vm1600_vm10 = vcmp.ne.s32.totalorder %v1130_v44, 4294967295  ;;  %vm1603_vm13 = vmmov %vm1599_vm2 }
  0x5a   : > { %v381_v40 = vsel %vm1600_vm10, %v357_v33, 0.0  ;;  %vm1601_vm12 = vcmp.ne.s32.totalorder %v1132_v49, 4294967295  ;;  %544 = vst [vmem:[%s1435_s15 + $0x8] sm:$0xff] %v443_v29  ;;  %v483_v45 = vadd.f32 %v482_v32, %v475_v25  ;;  %vm1602_vm3 = vcmp.ne.s32.totalorder %v1134_v52, 4294967295  ;;  %vm1604_vm14 = vmmov %vm1600_vm10 }
  0x5b   : > { %v382_v42 = vsel %vm1601_vm12, %v358_v58, 0.0  ;;  %v383_v17 = vsel %vm1602_vm3, %v359_v63, 0.0  ;;  %v396_v30 = vadd.f32 %v1308_v47, %v380_v37  ;;  %v397_v46 = vadd.f32 %v1318_v50, %v381_v40  ;;  %vm1605_vm4 = vmmov %vm1601_vm12 }
  0x5c   : > { %v522_v1 = vadd.f32 %v521_v38, %v514_v34  ;;  %v398_v48 = vadd.f32 %v1322_v51, %v382_v42  ;;  %v399_v10 = vadd.f32 %v1326_v53, %v383_v17  ;;  %v420_v33 = vsel %vm1603_vm13, %v360_v21, 0.0  ;;  %545 = vst [vmem:[%s1435_s15 + $0x10] sm:$0xff] %v483_v45  ;;  %vm1606_vm5 = vmmov %vm1602_vm3 }
  0x5d   : > { %v407_v58 = vadd.f32 %v397_v46, %v396_v30  ;;  %v421_v8 = vsel %vm1604_vm14, %v361_v36, 0.0  ;;  %v422_v47 = vsel %vm1605_vm4, %v362_v16, 0.0  ;;  %v423_v50 = vsel %vm1606_vm5, %v363_v20, 0.0  ;;  %vm1607_vm8 = vmmov %vm1599_vm2 }
  0x5e   : > { %v523_v63 = vadd.f32 %v522_v1, %v515_v35  ;;  %v436_v51 = vadd.f32 %v1330_v54, %v420_v33  ;;  %v437_v53 = vadd.f32 %v1334_v55, %v421_v8  ;;  %v438_v18 = vadd.f32 %v1338_v56, %v422_v47  ;;  %vm1608_vm7 = vmmov %vm1600_vm10 }
  0x5f   : > { %v408_v4 = vadd.f32 %v407_v58, %v398_v48  ;;  %v439_v21 = vadd.f32 %v1342_v57, %v423_v50  ;;  %v460_v36 = vsel %vm1607_vm8, %v1379_v24, 0.0  ;;  %v461_v16 = vsel %vm1608_vm7, %v1386_v39, 0.0  ;;  %vm1609_vm0 = vmmov %vm1605_vm4 }
  0x60   : > { %546 = vst [vmem:[%s1435_s15 + $0x18] sm:$0xff] %v523_v63  ;;  %v447_v20 = vadd.f32 %v437_v53, %v436_v51  ;;  %v462_v54 = vsel %vm1609_vm0, %v366_v11, 0.0  ;;  %vm1610_vm6 = vmmov %vm1602_vm3  ;;  %v476_v56 = vadd.f32 %v1346_v59, %v460_v36  ;;  %v477_v24 = vadd.f32 %v1350_v60, %v461_v16 }
  0x61   : > { %v463_v55 = vsel %vm1610_vm6, %v367_v19, 0.0  ;;  %v409_v57 = vadd.f32 %v408_v4, %v399_v10  ;;  %v478_v13 = vadd.f32 %v1354_v62, %v462_v54  ;;  %vm1611_vm15 = vmmov %vm1599_vm2 }
  0x62   : > { %v479_v39 = vadd.f32 %v1358_v0, %v463_v55  ;;  %v448_v2 = vadd.f32 %v447_v20, %v438_v18  ;;  %v500_v12 = vsel %vm1611_vm15, %v1381_v27, 0.0  ;;  %vm1612_vm1 = vmmov %vm1608_vm7  ;;  %v487_v60 = vadd.f32 %v477_v24, %v476_v56 }
  0x63   : > { %v501_v11 = vsel %vm1612_vm1, %v1388_v41, 0.0  ;;  %vm1613_vm11 = vmmov %vm1609_vm0  ;;  %547 = vst [vmem:[%s1435_s15 + $0x20] sm:$0xff] %v409_v57  ;;  %v516_v43 = vadd.f32 %v1362_v3, %v500_v12 }
  0x64   : > { %v502_v59 = vsel %vm1613_vm11, %v370_v23, 0.0  ;;  %vm1614_vm9 = vmmov %vm1602_vm3  ;;  %v517_v44 = vadd.f32 %v1366_v5, %v501_v11  ;;  %v449_v0 = vadd.f32 %v448_v2, %v439_v21  ;;  %v488_v27 = vadd.f32 %v487_v60, %v478_v13 }
  0x65   : > { %v503_v62 = vsel %vm1614_vm9, %v371_v6, 0.0  ;;  %v518_v49 = vadd.f32 %v1370_v7, %v502_v59 }
  0x66   : > { %v519_v41 = vadd.f32 %v1374_v9, %v503_v62  ;;  %v527_v19 = vadd.f32 %v517_v44, %v516_v43  ;;  %548 = vst [vmem:[%s1435_s15 + $0x28] sm:$0xff] %v449_v0  ;;  %v489_v52 = vadd.f32 %v488_v27, %v479_v39 }
  0x68   : > { %v528_v14 = vadd.f32 %v527_v19, %v518_v49  ;;  %549 = vst [vmem:[%s1435_s15 + $0x30] sm:$0xff] %v489_v52 }
  0x6a   : > { %v529_v3 = vadd.f32 %v528_v14, %v519_v41 }
  0x6c   : > { %550 = vst [vmem:[%s1435_s15 + $0x38] sm:$0xff] %v529_v3 }
  0x6d   : > { %932 = shalt.err (!%p929_p13)
}
  0x6e   : > { %s996_s3 = smov 128   ;;  %s997_s6 = smov 8  }
  0x6f   : > { %737 = dma.vmem_to_hbm [thread:$0]  (%p1064_p9), %s567_s26, 1024, %s569_s19, %s552_s27, %s996_s3, %s996_s3, %s997_s6  }
  0x70 PF: > { %s583_s8 = sand.u32 1, %s971_s9   ;;  %p747_p0 = pnand %p688_p12, %p1071_p11 }
  0x71   : > { %s584_s21 = scalar_lea.sflag [#allocation5], %s583_s8 }
  0x72   : > { %p748_p1 = pneg %p747_p0 }
  0x74   : > { %966 = dma.done.wait (%p748_p1), %s584_s21, 1024  }
  0x75   : > { %968 = vsyncadd (%p748_p1), %s584_s21, 4294966272  ;;  %s21_s14 = sadd.s32 1, %s991_s14   ;;  %s1615_s9 = smov %s975_s10 }
  0x76   : > { %p18_p2 = scmp.ge.s32.totalorder %s21_s14, 4   ;;  %s1616_s10 = smov %s979_s11 }
  0x77   : > { %s1617_s11 = smov %s1069_s23  ;;  %s1618_s12 = smov %s987_s13 }
  0x78   : > { %s1619_s13 = smov %s1621_s17  ;;  %20 = sbr.rel (!%p18_p2) target bundleno = 8 (0x8), region = 97 }
  0x7d   :  { %590 = vsyncpa [#allocation4], 1 }
  0x7e   :  { %592 = vsyncpa [#allocation4 + $0x1], 1 }
  0x7f   :  { %593 = vsyncpa [#allocation7], 1 }
  0x80   :  { %595 = vsyncpa [#allocation7 + $0x1], 1 }
  0x81   :  { %596 = vsyncpa [#allocation5], 1 }
  0x82   :  { %598 = vsyncpa [#allocation5 + $0x1], 1 }

</bundles_post_ra>
